<compile_context>
chip_gen: v6e
topology: v6e:2x2x1
jax: 0.10.0
libtpu: 0.0.40
codegen_flags: <defaults>
</compile_context>

<pallas_src>
from functools import partial
from typing import NamedTuple

import jax
import jax.numpy as jnp
from jax import lax
from jax.experimental import pallas as pl
from jax.experimental.pallas import tpu as pltpu


LANE = 128     # last-dim (lane) tile
SUBLANE = 8    # second-to-last-dim (sublane) tile


def _round_up(x: int, m: int) -> int:
    return (x + m - 1) // m * m


# ------------------------------ fused kernel ------------------------------ #

def _mtmlp_packed_kernel(*refs, n_layers: int):
    """One points-block per grid step; the whole layer stack runs in VMEM.

    refs = (x_ref, w_0..w_{L-1}, b_0..b_{L-1}, o_ref)
      x_ref : (n_blk, T*d_x)            task-packed input rows
      w_i   : (T*d_in_i, N_i)           block-diagonal weights (N_i = T*d_out_i,
                                        last layer padded to a 128 multiple)
      b_i   : (1, N_i)  f32             task-packed bias
      o_ref : (n_blk, N_last)           lane-dense output block
    """
    x_ref = refs[0]
    w_refs = refs[1:1 + n_layers]
    b_refs = refs[1 + n_layers:1 + 2 * n_layers]
    o_ref = refs[1 + 2 * n_layers]

    compute_dtype = w_refs[0].dtype                  # f32 (exact) or bf16 (fast)
    h = x_ref[...].astype(compute_dtype)
    for i in range(n_layers):                        # unrolled at trace time
        acc = jnp.dot(h, w_refs[i][...],
                      preferred_element_type=jnp.float32)   # MXU, f32 accumulation
        acc = acc + b_refs[i][...]                   # f32 bias epilogue (v5e-safe)
        if i < n_layers - 1:
            acc = jnp.tanh(acc)                      # EUP transcendental, f32
            h = acc.astype(compute_dtype)            # no-op when compute is f32
        else:
            h = acc
    o_ref[...] = h.astype(o_ref.dtype)


# --------------------------- packed (cached) params ------------------------ #

class PackedMTMLP(NamedTuple):
    weights: tuple   # L arrays, (T*d_in_i, N_i)
    biases: tuple    # L arrays, (1, N_i) f32
    n_task: int
    d_x: int
    d_y: int


def pack_mtmlp_params(params, *, weight_dtype=jnp.float32) -> PackedMTMLP:
    """Block-diagonal, pre-transposed weights/biases.  Call ONCE and cache.

    params: list of (w, b) with w (n_task, d_out, d_in), b (n_task, d_out).
    weight_dtype=jnp.bfloat16 enables bf16 MXU operands (opt-in, f32 accumulate).
    """
    n_layers = len(params)
    n_task = params[0][0].shape[0]
    d_x = params[0][0].shape[2]
    d_y = params[-1][0].shape[1]

    ws, bs = [], []
    for i, (w, b) in enumerate(params):
        _, d_out, d_in = w.shape
        k_dim = n_task * d_in
        n_dim = n_task * d_out
        # Only the final output lane dim is padded to 128 (dense vst);
        # intermediate dims stay unpadded (Mosaic pads VMEM layout internally).
        n_pad = _round_up(n_dim, LANE) if i == n_layers - 1 else n_dim

        wt = jnp.swapaxes(w, 1, 2).astype(weight_dtype)        # (T, d_in, d_out)
        wbd = jnp.zeros((k_dim, n_pad), weight_dtype)
        for t in range(n_task):                                # pack-time only
            wbd = wbd.at[t * d_in:(t + 1) * d_in,
                         t * d_out:(t + 1) * d_out].set(wt[t])
        bp = jnp.zeros((1, n_pad), jnp.float32)
        bp = bp.at[0, :n_dim].set(b.astype(jnp.float32).reshape(-1))
        ws.append(wbd)
        bs.append(bp)
    return PackedMTMLP(tuple(ws), tuple(bs), n_task, d_x, d_y)


# ------------------------------ VMEM sizing -------------------------------- #

def _tpu_vmem_limit_bytes() -> int:
    """Generation-aware VMEM limit: ~3/4 of physical capacity, capped at 100 MiB."""
    cap = 128 << 20
    try:
        info = pltpu.get_tpu_info()
        cap = int(getattr(info, "vmem_capacity_bytes", cap))
    except Exception:
        pass
    return int(min(cap * 3 // 4, 100 << 20))


def _vmem_estimate_bytes(n_blk, k0, packed, x_itemsize, out_itemsize):
    """Per-step VMEM estimate incl. live f32 intermediate activations."""
    widths = [k0] + [w.shape[1] for w in packed.weights]
    w_bytes = sum(int(w.size) * w.dtype.itemsize for w in packed.weights)
    b_bytes = sum(int(b.size) * b.dtype.itemsize for b in packed.biases)
    xb = n_blk * k0 * x_itemsize
    ob = n_blk * widths[-1] * out_itemsize
    hb = 2 * n_blk * max(widths) * 4              # two live f32 h tensors per layer
    # x/out double-buffered; weights/biases also conservatively x2 (default bufs).
    return 2 * (xb + ob) + 2 * (w_bytes + b_bytes) + hb


# ----------------------------- wrapper / API ------------------------------- #

def mtmlp_forward(x: jax.Array, packed: PackedMTMLP) -> jax.Array:
    """Forward pass of MultiTaskMultiLayerPerceptron.

    x      : (n_task, n_points, d_x)
    packed : output of pack_mtmlp_params (cached across calls)
    Returns (n_task, n_points, d_y).
    """
    assert x.ndim == 3
    T, N, d_x = x.shape
    assert T == packed.n_task and d_x == packed.d_x
    n_layers = len(packed.weights)
    d_y = packed.d_y
    k0 = T * d_x
    out_w = packed.weights[-1].shape[1]           # 128-padded T*d_y

    vmem_limit = _tpu_vmem_limit_bytes()
    budget = vmem_limit * 3 // 4                  # headroom vs. declared limit

    # Points-block selection: <=512 rows/step, >=2 grid steps when there are
    # enough rows (both v7x TensorCores get work; x/out DMAs pipeline under the
    # current step's MXU work), shrink if the VMEM estimate would not fit.
    n_p0 = _round_up(max(N, SUBLANE), SUBLANE)
    n_blk = min(512, n_p0)
    if n_p0 >= 2 * SUBLANE and n_blk >= n_p0:
        n_blk = _round_up((n_p0 + 1) // 2, SUBLANE)
    while n_blk > SUBLANE and _vmem_estimate_bytes(
            n_blk, k0, packed, x.dtype.itemsize, x.dtype.itemsize) > budget:
        n_blk = max(SUBLANE, _round_up(n_blk // 2, SUBLANE))
    n_p = _round_up(n_p0, n_blk)

    # Task-pack x along the feature axis: row n = [x[0,n,:], x[1,n,:], ...].
    x_packed = jnp.swapaxes(x, 0, 1).reshape(N, k0)
    xp = jnp.zeros((n_p, k0), x.dtype).at[:N].set(x_packed)

    grid = (n_p // n_blk,)
    x_spec = pl.BlockSpec((n_blk, k0), lambda n: (n, 0))
    # Constant index_map -> weights/biases stay resident across grid steps.
    # (On v7x at grid==1 a single-buffered weight spec would halve weight VMEM,
    #  but weights here are tiny, so default buffering is kept.)
    w_specs = [pl.BlockSpec(w.shape, lambda n: (0, 0)) for w in packed.weights]
    b_specs = [pl.BlockSpec(b.shape, lambda n: (0, 0)) for b in packed.biases]
    out_spec = pl.BlockSpec((n_blk, out_w), lambda n: (n, 0))

    out_padded = pl.pallas_call(
        partial(_mtmlp_packed_kernel, n_layers=n_layers),
        out_shape=jax.ShapeDtypeStruct((n_p, out_w), x.dtype),
        grid_spec=pltpu.PrefetchScalarGridSpec(
            num_scalar_prefetch=0,
            grid=grid,
            in_specs=[x_spec] + w_specs + b_specs,
            out_specs=out_spec,
        ),
        compiler_params=pltpu.CompilerParams(
            dimension_semantics=("parallel",),
            vmem_limit_bytes=vmem_limit,
        ),
    )(xp, *packed.weights, *packed.biases)

    # Un-pack: columns [t*d_y:(t+1)*d_y] belong to task t.
    out = out_padded[:N, :T * d_y].reshape(N, T, d_y)
    return jnp.swapaxes(out, 0, 1)


# ------------------------------ param init --------------------------------- #

def init_mtmlp_params(key, d_x, d_y, n_hidden, d_hidden, n_task):
    """Per-task parameters (torch.nn.Linear-style uniform init)."""
    dims = []
    if n_hidden == 0:
        dims.append((d_x, d_y))
    else:
        dims.append((d_x, d_hidden))
        for _ in range(n_hidden - 1):
            dims.append((d_hidden, d_hidden))
        dims.append((d_hidden, d_y))

    params = []
    for (d_in, d_out) in dims:
        key, kw, kb = jax.random.split(key, 3)
        bound = 1.0 / float(jnp.sqrt(jnp.float32(d_in)))
        w = jax.random.uniform(kw, (n_task, d_out, d_in), jnp.float32,
                               minval=-bound, maxval=bound)
        b = jax.random.uniform(kb, (n_task, d_out), jnp.float32,
                               minval=-bound, maxval=bound)
        params.append((w, b))
    return params


# ------------------------------- reference --------------------------------- #

def mtmlp_forward_ref(x, params):
    """Pure-JAX reference for correctness checking."""
    h = x
    n_layers = len(params)
    for i, (w, b) in enumerate(params):
        h = jnp.einsum('tnd,tod->tno', h, w,
                       precision=lax.Precision.HIGHEST) + b[:, None, :]
        if i < n_layers - 1:
            h = jnp.tanh(h)
    return h


# ---------------------------------- main ------------------------------------ #

if __name__ == "__main__":
    # Shapes consistent with the module's forward (x.ndim == 3):
    #   n_task=3 tasks, n_points=8 context points, d_x=4 -> d_y=2,
    #   n_hidden=2 hidden layers of width d_hidden=32.
    d_x, d_y, n_hidden, d_hidden = 4, 2, 2, 32
    n_task, n_points = 3, 8

    key = jax.random.PRNGKey(0)
    key, kx = jax.random.split(key)
    x = jax.random.normal(kx, (n_task, n_points, d_x), jnp.float32)

    params = init_mtmlp_params(key, d_x, d_y, n_hidden, d_hidden, n_task)

    # Pack / transpose / pad ONCE (cached across forward calls).
    # For higher MXU throughput: pack_mtmlp_params(params, weight_dtype=jnp.bfloat16)
    # (opt-in; loosens the tolerance below).
    packed = pack_mtmlp_params(params)

    pred = mtmlp_forward(x, packed)
    pred = jax.block_until_ready(pred)

    ref = mtmlp_forward_ref(x, params)
    assert pred.shape == (n_task, n_points, d_y)
    assert jnp.allclose(pred, ref, atol=2e-5, rtol=2e-5), \
        float(jnp.max(jnp.abs(pred - ref)))

    print("KERNEL_OK")
</pallas_src>

<mosaic_0001>
module attributes {stable_mosaic.version = 11 : i64} {
  func.func @_mtmlp_packed_kernel(%arg0: i32, %arg1: memref<8x12xf32, #tpu.memory_space<vmem>>, %arg2: memref<12x96xf32, #tpu.memory_space<vmem>>, %arg3: memref<96x96xf32, #tpu.memory_space<vmem>>, %arg4: memref<96x128xf32, #tpu.memory_space<vmem>>, %arg5: memref<1x96xf32, #tpu.memory_space<vmem>>, %arg6: memref<1x96xf32, #tpu.memory_space<vmem>>, %arg7: memref<1x128xf32, #tpu.memory_space<vmem>>, %arg8: memref<8x128xf32, #tpu.memory_space<vmem>>) attributes {dimension_semantics = [#tpu.dimension_semantics<parallel>], iteration_bounds = array<i64: 1>, scalar_prefetch = 0 : i64, scratch_operands = 0 : i64, tpu.core_type = #tpu.core_type<tc>, window_params = [{transform_indices = @transform_0, window_bounds = array<i64: 8, 12>}, {pipeline_mode = #tpu.pipeline_mode<synchronous>, transform_indices = @transform_1, window_bounds = array<i64: 12, 96>}, {pipeline_mode = #tpu.pipeline_mode<synchronous>, transform_indices = @transform_2, window_bounds = array<i64: 96, 96>}, {pipeline_mode = #tpu.pipeline_mode<synchronous>, transform_indices = @transform_3, window_bounds = array<i64: 96, 128>}, {pipeline_mode = #tpu.pipeline_mode<synchronous>, transform_indices = @transform_4, window_bounds = array<i64: 1, 96>}, {pipeline_mode = #tpu.pipeline_mode<synchronous>, transform_indices = @transform_5, window_bounds = array<i64: 1, 96>}, {pipeline_mode = #tpu.pipeline_mode<synchronous>, transform_indices = @transform_6, window_bounds = array<i64: 1, 128>}, {transform_indices = @transform_7, window_bounds = array<i64: 8, 128>}]} {
    %c0 = arith.constant 0 : index
    %c0_0 = arith.constant 0 : index
    %0 = vector.load %arg1[%c0, %c0_0] : memref<8x12xf32, #tpu.memory_space<vmem>>, vector<8x12xf32>
    %c0_1 = arith.constant 0 : index
    %c0_2 = arith.constant 0 : index
    %1 = vector.load %arg2[%c0_1, %c0_2] : memref<12x96xf32, #tpu.memory_space<vmem>>, vector<12x96xf32>
    %cst = arith.constant dense<0.000000e+00> : vector<8x96xf32>
    %2 = tpu.matmul %0, %1, %cst {dimension_numbers = #tpu.dot_dimension_numbers<[1], [0], [0], [1], [0, 0, 1, 1], [], []>} : vector<8x12xf32>, vector<12x96xf32>, vector<8x96xf32> -> vector<8x96xf32>
    %c0_3 = arith.constant 0 : index
    %c0_4 = arith.constant 0 : index
    %3 = vector.load %arg5[%c0_3, %c0_4] : memref<1x96xf32, #tpu.memory_space<vmem>>, vector<1x96xf32>
    %4 = vector.broadcast %3 : vector<1x96xf32> to vector<8x96xf32>
    %5 = arith.addf %2, %4 : vector<8x96xf32>
    %6 = math.tanh %5 : vector<8x96xf32>
    %c0_5 = arith.constant 0 : index
    %c0_6 = arith.constant 0 : index
    %7 = vector.load %arg3[%c0_5, %c0_6] : memref<96x96xf32, #tpu.memory_space<vmem>>, vector<96x96xf32>
    %cst_7 = arith.constant dense<0.000000e+00> : vector<8x96xf32>
    %8 = tpu.matmul %6, %7, %cst_7 {dimension_numbers = #tpu.dot_dimension_numbers<[1], [0], [0], [1], [0, 0, 1, 1], [], []>} : vector<8x96xf32>, vector<96x96xf32>, vector<8x96xf32> -> vector<8x96xf32>
    %c0_8 = arith.constant 0 : index
    %c0_9 = arith.constant 0 : index
    %9 = vector.load %arg6[%c0_8, %c0_9] : memref<1x96xf32, #tpu.memory_space<vmem>>, vector<1x96xf32>
    %10 = vector.broadcast %9 : vector<1x96xf32> to vector<8x96xf32>
    %11 = arith.addf %8, %10 : vector<8x96xf32>
    %12 = math.tanh %11 : vector<8x96xf32>
    %c0_10 = arith.constant 0 : index
    %c0_11 = arith.constant 0 : index
    %13 = vector.load %arg4[%c0_10, %c0_11] : memref<96x128xf32, #tpu.memory_space<vmem>>, vector<96x128xf32>
    %cst_12 = arith.constant dense<0.000000e+00> : vector<8x128xf32>
    %14 = tpu.matmul %12, %13, %cst_12 {dimension_numbers = #tpu.dot_dimension_numbers<[1], [0], [0], [1], [0, 0, 1, 1], [], []>} : vector<8x96xf32>, vector<96x128xf32>, vector<8x128xf32> -> vector<8x128xf32>
    %c0_13 = arith.constant 0 : index
    %c0_14 = arith.constant 0 : index
    %15 = vector.load %arg7[%c0_13, %c0_14] : memref<1x128xf32, #tpu.memory_space<vmem>>, vector<1x128xf32>
    %16 = vector.broadcast %15 : vector<1x128xf32> to vector<8x128xf32>
    %17 = arith.addf %14, %16 : vector<8x128xf32>
    %c0_15 = arith.constant 0 : index
    %c0_16 = arith.constant 0 : index
    %18 = vector.load %arg8[%c0_15, %c0_16] : memref<8x128xf32, #tpu.memory_space<vmem>>, vector<8x128xf32>
    tpu.vector_store %arg8[%c0_15, %c0_16], %17 {strides = array<i32>} : memref<8x128xf32, #tpu.memory_space<vmem>>, vector<8x128xf32>,
    return
  }
  func.func @transform_0(%arg0: i32) -> (i32, i32) {
    %c0_i32 = arith.constant 0 : i32
    %c0_i32_0 = arith.constant 0 : i32
    return %arg0, %c0_i32 : i32, i32
  }
  func.func @transform_1(%arg0: i32) -> (i32, i32) {
    %c0_i32 = arith.constant 0 : i32
    %c0_i32_0 = arith.constant 0 : i32
    %c0_i32_1 = arith.constant 0 : i32
    return %c0_i32, %c0_i32_0 : i32, i32
  }
  func.func @transform_2(%arg0: i32) -> (i32, i32) {
    %c0_i32 = arith.constant 0 : i32
    %c0_i32_0 = arith.constant 0 : i32
    %c0_i32_1 = arith.constant 0 : i32
    return %c0_i32, %c0_i32_0 : i32, i32
  }
  func.func @transform_3(%arg0: i32) -> (i32, i32) {
    %c0_i32 = arith.constant 0 : i32
    %c0_i32_0 = arith.constant 0 : i32
    %c0_i32_1 = arith.constant 0 : i32
    return %c0_i32, %c0_i32_0 : i32, i32
  }
  func.func @transform_4(%arg0: i32) -> (i32, i32) {
    %c0_i32 = arith.constant 0 : i32
    %c0_i32_0 = arith.constant 0 : i32
    %c0_i32_1 = arith.constant 0 : i32
    return %c0_i32, %c0_i32_0 : i32, i32
  }
  func.func @transform_5(%arg0: i32) -> (i32, i32) {
    %c0_i32 = arith.constant 0 : i32
    %c0_i32_0 = arith.constant 0 : i32
    %c0_i32_1 = arith.constant 0 : i32
    return %c0_i32, %c0_i32_0 : i32, i32
  }
  func.func @transform_6(%arg0: i32) -> (i32, i32) {
    %c0_i32 = arith.constant 0 : i32
    %c0_i32_0 = arith.constant 0 : i32
    %c0_i32_1 = arith.constant 0 : i32
    return %c0_i32, %c0_i32_0 : i32, i32
  }
  func.func @transform_7(%arg0: i32) -> (i32, i32) {
    %c0_i32 = arith.constant 0 : i32
    %c0_i32_0 = arith.constant 0 : i32
    return %arg0, %c0_i32 : i32, i32
  }
}

</mosaic_0001>

<bundles_post_ra>
// kernel: tpu_custom_call.1
= control target key start
LH: loop header
LB: loop body
LE: loop exit
PB: predicated region body
PF: predicated region fallthrough
CT: control target
= control target key end

     0   :  { %12 = vsyncpa [#allocation3], 0  ;;  %s707_s0 = inlined_call_operand.hbm [shape: f32[8,12], index: 0, kind: input, shape index: {}]   ;;  %s708_s1 = inlined_call_operand.hbm [shape: f32[12,96], index: 1, kind: input, shape index: {}]   ;;  %s709_s2 = inlined_call_operand.hbm [shape: f32[96,96], index: 2, kind: input, shape index: {}]   ;;  %s710_s3 = inlined_call_operand.hbm [shape: f32[96,128], index: 3, kind: input, shape index: {}]   ;;  %s711_s4 = inlined_call_operand.vmem [shape: f32[1,96], index: 4, kind: input, shape index: {}]   ;;  %s712_s5 = inlined_call_operand.vmem [shape: f32[1,96], index: 5, kind: input, shape index: {}]   ;;  %s713_s6 = inlined_call_operand.vmem [shape: f32[1,128], index: 6, kind: input, shape index: {}]   ;;  %s714_s7 = inlined_call_operand.hbm [shape: f32[8,128], index: 7, kind: output, shape index: {}]  }
   0x1   :  { %13 = vsyncpa [#allocation6], 0 }
   0x2   :  { %14 = vsyncpa [#allocation9], 0 }
   0x3   :  { %15 = vsyncpa [#allocation4], 0  ;;  %s591_s24 = smov [#allocation5]  }
   0x4   :  { %s31_s25 = sshll.u32 %s591_s24, 4  ;;  %s32_s25 = int_to_ptr.vmem [resolvable:$true] %s31_s25 }
   0x5   :  { %s491_s26 = scalar_lea.vmem %s32_s25, 256  ;;  %p496_p1 = scmp.lt.s32.totalorder %s32_s25, %s32_s25 }
   0x6   :  { %p492_p0 = scmp.ne.s32.totalorder %s32_s25, %s491_s26  ;;  %p497_p2 = scmp.lt.s32.totalorder %s491_s26, %s491_s26 }
   0x8   :  { %p498_p3 = por %p497_p2, %p496_p1 }
   0xa   :  { %p499_p4 = pnand %p498_p3, %p492_p0 }
   0xc   :  { %502 = shalt.err (!%p499_p4)
}
   0xd   :  { %s592_s27 = smov 128   ;;  %s593_s28 = smov 8  }
   0xe   :  { %37 = dma.hbm_to_vmem [thread:$0]  %s708_s1, 256, %s32_s25, [#allocation6], %s592_s27, %s592_s27, %s593_s28  }
   0xf   :  { %s594_s8 = smov [#allocation2]   ;;  %s595_s10 = smov [#allocation7]  }
  0x10   :  { %s22_s9 = sshll.u32 %s594_s8, 4  ;;  %s43_s11 = sshll.u32 %s595_s10, 4  ;;  %s23_s9 = int_to_ptr.vmem [resolvable:$true] %s22_s9  ;;  %s44_s11 = int_to_ptr.vmem [resolvable:$true] %s43_s11 }
  0x11   :  { %s511_s12 = scalar_lea.vmem %s23_s9, 128  ;;  %p516_p6 = scmp.lt.s32.totalorder %s23_s9, %s23_s9 }
  0x12   :  { %p512_p5 = scmp.ne.s32.totalorder %s23_s9, %s511_s12  ;;  %p517_p7 = scmp.lt.s32.totalorder %s511_s12, %s511_s12 }
  0x14   :  { %p518_p8 = por %p517_p7, %p516_p6 }
  0x16   :  { %p519_p9 = pnand %p518_p8, %p512_p5 }
  0x18   :  { %522 = shalt.err (!%p519_p9)
}
  0x19   :  { %25 = dma.hbm_to_vmem [thread:$0]  %s707_s0, 128, %s23_s9, [#allocation3]  }
  0x1a   :  { %s531_s15 = scalar_lea.vmem %s44_s11, 1536  ;;  %p536_p11 = scmp.lt.s32.totalorder %s44_s11, %s44_s11 }
  0x1b   :  { %p532_p10 = scmp.ne.s32.totalorder %s44_s11, %s531_s15  ;;  %p537_p12 = scmp.lt.s32.totalorder %s531_s15, %s531_s15 }
  0x1d   :  { %p538_p13 = por %p537_p12, %p536_p11 }
  0x1f   :  { %p539_p0 = pnand %p538_p13, %p532_p10 }
  0x21   :  { %542 = shalt.err (!%p539_p0)
}
  0x22   :  { %49 = dma.hbm_to_vmem [thread:$0]  %s709_s2, 1536, %s44_s11, [#allocation6], %s592_s27, %s592_s27, %s593_s28  }
  0x23   :  { %s596_s17 = smov [#allocation8]  }
  0x24   :  { %s55_s18 = sshll.u32 %s596_s17, 4  ;;  %s56_s18 = int_to_ptr.vmem [resolvable:$true] %s55_s18 }
  0x25   :  { %s551_s19 = scalar_lea.vmem %s56_s18, 1536  ;;  %p556_p2 = scmp.lt.s32.totalorder %s56_s18, %s56_s18 }
  0x26   :  { %p552_p1 = scmp.ne.s32.totalorder %s56_s18, %s551_s19  ;;  %p557_p3 = scmp.lt.s32.totalorder %s551_s19, %s551_s19 }
  0x28   :  { %p558_p4 = por %p557_p3, %p556_p2 }
  0x2a   :  { %p559_p5 = pnand %p558_p4, %p552_p1 }
  0x2c   :  { %562 = shalt.err (!%p559_p5)
}
  0x2d   :  { %61 = dma.hbm_to_vmem [thread:$0]  %s710_s3, 1536, %s56_s18, [#allocation9], %s592_s27, %s592_s27, %s593_s28  }
  0x2e   :  { %583 = dma.done.wait [#allocation3], 128  }
  0x2f   :  { %584 = vsyncadd [#allocation3], 4294967168 }
  0x30   :  { %585 = dma.done.wait [#allocation6], 1792  }
  0x31   :  { %586 = vsyncadd [#allocation6], 4294965504 }
  0x32   :  { %587 = dma.done.wait [#allocation9], 1536  }
  0x33   :  { %588 = vsyncadd [#allocation9], 4294965760  ;;  %v597_v0 = vmov 0.0   ;;  %vm598_vm0 = vmmov 0   ;;  %vm94_vm1 = vcmask 1043456   ;;  %v81_v2 = vld [vmem:[#allocation5] sm:$0xff] }
  0x34   :  { %409 = vmatprep.subr.mxu0 %v597_v0  ;;  %413 = vmatprep.mubr.msk.f32.mxu0 %vm598_vm0, %v597_v0  ;;  %v82_v1 = vld [vmem:[#allocation5 + $0x8] sm:$0xf]  ;;  %v80_v3 = vld [vmem:[#allocation2] sm:$0xff]  ;;  %vm90_vm2 = vcmask 97280   ;;  %v179_v5 = vld [vmem:[#allocation7 + $0x50] sm:$0xff]  ;;  %vm188_vm3 = vcmask 785408  }
  0x35   :  { %416 = vmatprep.subr.mxu1 %v597_v0  ;;  %440 = vmatprep.mubr.msk.f32.mxu1 %vm598_vm0, %v597_v0  ;;  %v180_v4 = vld [vmem:[#allocation7 + $0x58] sm:$0xff]  ;;  %v178_v6 = vld [vmem:[#allocation7 + $0x48] sm:$0xff]  ;;  %v177_v7 = vld [vmem:[#allocation7 + $0x40] sm:$0xff]  ;;  %s599_s24 = smov [#allocation10]  }
  0x36   :  { %410 = vmatpush3.msk.msra.mxu0 %vm94_vm1, %v82_v1  ;;  %417 = vmatpush3.msra.mxu1 %v180_v4  ;;  %v176_v8 = vld [vmem:[#allocation7 + $0x38] sm:$0xff]  ;;  %v175_v9 = vld [vmem:[#allocation7 + $0x30] sm:$0xff]  ;;  %v174_v10 = vld [vmem:[#allocation7 + $0x28] sm:$0xff]  ;;  %s362_s25 = sshll.u32 %s599_s24, 4  ;;  %s363_s25 = int_to_ptr.vmem [resolvable:$true] %s362_s25 }
  0x37   :  { %411 = vmatprep.subr.mxu0 %v597_v0  ;;  %418 = vmatprep.subr.mxu1 %v597_v0  ;;  %v173_v11 = vld [vmem:[#allocation7 + $0x20] sm:$0xff]  ;;  %v172_v12 = vld [vmem:[#allocation7 + $0x18] sm:$0xff]  ;;  %v171_v13 = vld [vmem:[#allocation7 + $0x10] sm:$0xff]  ;;  %s563_s26 = scalar_lea.vmem %s363_s25, 128  ;;  %p568_p7 = scmp.lt.s32.totalorder %s363_s25, %s363_s25 }
  0x38   :  { %412 = vmatpush3.msra.mxu0 %v81_v2  ;;  %419 = vmatpush3.msra.mxu1 %v179_v5  ;;  %v170_v14 = vld [vmem:[#allocation7 + $0x8] sm:$0xff]  ;;  %v169_v15 = vld [vmem:[#allocation7] sm:$0xff]  ;;  %v274_v16 = vld [vmem:[#allocation8 + $0x58] sm:$0xff]  ;;  %p564_p6 = scmp.ne.s32.totalorder %s363_s25, %s563_s26  ;;  %p569_p8 = scmp.lt.s32.totalorder %s563_s26, %s563_s26 }
  0x39   :  { %414 = vmatmul.mubr.msk.f32.vlgmr.msra.gmra.mxu0 %vm90_vm2, %v80_v3  ;;  %420 = vmatprep.subr.mxu1 %v597_v0  ;;  %v273_v17 = vld [vmem:[#allocation8 + $0x50] sm:$0xff]  ;;  %v272_v18 = vld [vmem:[#allocation8 + $0x48] sm:$0xff]  ;;  %v271_v24 = vld [vmem:[#allocation8 + $0x40] sm:$0xff] }
  0x3a   :  { %443 = vmatprep.subr.mxu0 %v597_v0  ;;  %421 = vmatpush3.msra.mxu1 %v178_v6  ;;  %v373_v19 = vld [vmem:[%s711_s4] ss:$0 sm:$0xff]  ;;  %v270_v25 = vld [vmem:[#allocation8 + $0x38] sm:$0xff]  ;;  %v269_v26 = vld [vmem:[#allocation8 + $0x30] sm:$0xff]  ;;  %p570_p9 = por %p569_p8, %p568_p7 }
  0x3b   :  { %467 = vmatprep.mubr.msk.f32.mxu0 %vm598_vm0, %v597_v0  ;;  %422 = vmatprep.subr.mxu1 %v597_v0  ;;  %v268_v27 = vld [vmem:[#allocation8 + $0x28] sm:$0xff]  ;;  %v267_v28 = vld [vmem:[#allocation8 + $0x20] sm:$0xff]  ;;  %v266_v29 = vld [vmem:[#allocation8 + $0x18] sm:$0xff] }
  0x3c   :  { %423 = vmatpush3.msra.mxu1 %v177_v7  ;;  %444 = vmatpush3.msra.mxu0 %v274_v16  ;;  %v265_v30 = vld [vmem:[#allocation8 + $0x10] sm:$0xff]  ;;  %v264_v31 = vld [vmem:[#allocation8 + $0x8] sm:$0xff]  ;;  %v263_v32 = vld [vmem:[#allocation8] sm:$0xff]  ;;  %p571_p10 = pnand %p570_p9, %p564_p6 }
  0x3d   :  { %424 = vmatprep.subr.mxu1 %v597_v0  ;;  %445 = vmatprep.subr.mxu0 %v597_v0  ;;  %v376_v33 = vld [vmem:[%s712_s5] ss:$0 sm:$0xff] }
  0x3e   :  { %425 = vmatpush3.msra.mxu1 %v176_v8  ;;  %446 = vmatpush3.msra.mxu0 %v273_v17  ;;  %v378_v38 = vld [vmem:[%s713_s6] ss:$0 sm:$0xff] }
  0x3f   :  { %426 = vmatprep.subr.mxu1 %v597_v0  ;;  %447 = vmatprep.subr.mxu0 %v597_v0 }
  0x40   :  { %427 = vmatpush3.msra.mxu1 %v175_v9  ;;  %448 = vmatpush3.msra.mxu0 %v272_v18 }
  0x41   :  { %428 = vmatprep.subr.mxu1 %v597_v0  ;;  %449 = vmatprep.subr.mxu0 %v597_v0 }
  0x42   :  { %429 = vmatpush3.msra.mxu1 %v174_v10  ;;  %450 = vmatpush3.msra.mxu0 %v271_v24 }
  0x43   :  { %430 = vmatprep.subr.mxu1 %v597_v0  ;;  %451 = vmatprep.subr.mxu0 %v597_v0 }
  0x44   :  { %431 = vmatpush3.msra.mxu1 %v173_v11  ;;  %452 = vmatpush3.msra.mxu0 %v270_v25 }
  0x45   :  { %432 = vmatprep.subr.mxu1 %v597_v0  ;;  %453 = vmatprep.subr.mxu0 %v597_v0 }
  0x46   :  { %433 = vmatpush3.msra.mxu1 %v172_v12  ;;  %454 = vmatpush3.msra.mxu0 %v269_v26 }
  0x47   :  { %434 = vmatprep.subr.mxu1 %v597_v0  ;;  %455 = vmatprep.subr.mxu0 %v597_v0 }
  0x48   :  { %435 = vmatpush3.msra.mxu1 %v171_v13  ;;  %456 = vmatpush3.msra.mxu0 %v268_v27 }
  0x49   :  { %436 = vmatprep.subr.mxu1 %v597_v0  ;;  %457 = vmatprep.subr.mxu0 %v597_v0 }
  0x4a   :  { %437 = vmatpush3.msra.mxu1 %v170_v14  ;;  %458 = vmatpush3.msra.mxu0 %v267_v28 }
  0x4b   :  { %438 = vmatprep.subr.mxu1 %v597_v0  ;;  %459 = vmatprep.subr.mxu0 %v597_v0 }
  0x4c   :  { %439 = vmatpush3.msra.mxu1 %v169_v15  ;;  %460 = vmatpush3.msra.mxu0 %v266_v29 }
  0x4d   :  { %461 = vmatprep.subr.mxu0 %v597_v0 }
  0x4e   :  { %462 = vmatpush3.msra.mxu0 %v265_v30 }
  0x4f   :  { %463 = vmatprep.subr.mxu0 %v597_v0 }
  0x50   :  { %464 = vmatpush3.msra.mxu0 %v264_v31 }
  0x51   :  { %465 = vmatprep.subr.mxu0 %v597_v0 }
  0x52   :  { %466 = vmatpush3.msra.mxu0 %v263_v32 }
  0xf9   :  { %v164_v20 = vpop.f32.mrf.mxu0 }
  0xfa   :  { %v165_v21 = vadd.f32 %v373_v19, %v164_v20 }
  0xfb   :  { %v415_v22 = vpop.f32.mrf.mxu0 }
  0xfc   :  { %479 = vtanh.f32 %v165_v21 }
 0x109   :  { %v480_v23 = vpop.eup %479 }
 0x10a   :  { %441 = vmatmul.mubr.msk.f32.vlgmr.msra.gmra.mxu1 %vm188_vm3, %v480_v23 }
 0x1ca   :  { %v258_v34 = vpop.f32.mrf.mxu1 }
 0x1cb   :  { %v259_v35 = vadd.f32 %v376_v33, %v258_v34 }
 0x1cc   :  { %v442_v36 = vpop.f32.mrf.mxu1 }
 0x1cd   :  { %481 = vtanh.f32 %v259_v35 }
 0x1da   :  { %v482_v37 = vpop.eup %481 }
 0x1db   :  { %468 = vmatmul.mubr.msk.f32.vlgmr.msra.gmra.mxu0 %vm188_vm3, %v482_v37 }
 0x29b   :  { %v351_v39 = vpop.f32.mrf.mxu0 }
 0x29c   :  { %v352_v40 = vadd.f32 %v378_v38, %v351_v39 }
 0x29d   :  { %v469_v41 = vpop.f32.mrf.mxu0 }
 0x29e   :  { %355 = vst [vmem:[#allocation10] sm:$0xff] %v352_v40 }
 0x29f   :  { %574 = shalt.err (!%p571_p10)
}
 0x2a0   :  { %365 = dma.vmem_to_hbm [thread:$0]  %s363_s25, 128, %s714_s7, [#allocation4]  }
 0x2a1   :  { %589 = dma.done.wait [#allocation4], 128  }
 0x2a2   :  { %590 = vsyncadd [#allocation4], 4294967168 }
 0x2a3   :  { %369 = vsyncpa [#allocation3], 1 }
 0x2a4   :  { %370 = vsyncpa [#allocation6], 1 }
 0x2a5   :  { %371 = vsyncpa [#allocation9], 1 }
 0x2a6   :  { %372 = vsyncpa [#allocation4], 1 }

</bundles_post_ra>
